<compile_context>
chip_gen: v5e
topology: v5e:2x2
jax: 0.10.0
libtpu: 0.0.40
codegen_flags: <defaults>
</compile_context>

<pallas_src>
import re
import numpy as np
import jax
import jax.numpy as jnp
from jax.experimental import pallas as pl
from jax.experimental.pallas import tpu as pltpu


# ---------------------------------------------------------------------------
# Hardware queries
# ---------------------------------------------------------------------------

def _tpu_generation():
    """Best-effort TPU generation (5, 6, 7, ...) from device_kind; None if unknown."""
    try:
        kind = jax.devices()[0].device_kind.lower()
    except Exception:
        return None
    m = re.search(r"(\d+)", kind)
    return int(m.group(1)) if m else None


def _vmem_capacity_bytes(gen):
    try:
        return int(pltpu.get_tpu_info().vmem_capacity_bytes)
    except Exception:  # pragma: no cover - conservative fallback
        return (64 << 20) if gen == 7 else (128 << 20)


def _vmem_budget_bytes(gen, capacity):
    # Working-set budget for double-buffered blocks + scratch.  v7x has only
    # 64 MiB per TensorCore -> keep ~16-24 MiB; v5e/v6e (128 MiB) can take more,
    # but pipeline depth (not block size) is the goal, so stay modest anyway.
    if gen == 7 or capacity <= (64 << 20):
        return 24 << 20
    return 40 << 20


def _vmem_limit_bytes(capacity):
    # Scoped-VMEM compiler limit: above the default, safely below physical.
    return int(min(max(32 << 20, (capacity * 3) // 4), 96 << 20))


# ---------------------------------------------------------------------------
# Tiling heuristics
# ---------------------------------------------------------------------------

def _divisors(n):
    return [d for d in range(1, n + 1) if n % d == 0]


def _score(tile_bc, tile_l, BC, block_bytes, other_steps, gen, total_bytes):
    """Goodness of a tiling.  Targets (in order): sublane-friendly row counts,
    enough grid steps for DMA/compute overlap (even count on v7x's two cores),
    2-8 MiB per-step blocks, amortized per-tile q computation."""
    steps = (BC // tile_bc) * other_steps
    s = 0.0
    # Sublane friendliness of the row count (uint8 packs 32 rows per vreg).
    if tile_bc % 32 == 0:
        s += 4.0
    elif tile_bc % 8 == 0:
        s += 2.5
    elif tile_bc == BC:
        s += 2.0
    if tile_bc >= 32 or tile_bc == BC:
        s += 2.0
    # Pipeline depth: ~8 steps for big problems, fewer for tiny ones
    # (~0.35 us fixed overhead per grid step).
    useful = max(1, min(8, int(total_bytes // (2 << 20))))
    if gen == 7:
        useful = max(useful, min(4, int(total_bytes // (1 << 20))))
    s += 3.0 * min(steps, useful) / useful
    if steps > 4 * useful:
        s -= 1.0
    # Megacore (v7x): an odd step count idles one TensorCore at the tail.
    if gen == 7 and useful > 1:
        if steps >= 4 and steps % 2 == 0:
            s += 2.0
        elif steps % 2 == 0:
            s += 1.0
    # Per-step block (single copy, in + out) sweet spot.
    if (2 << 20) <= block_bytes <= (8 << 20):
        s += 2.0
    elif (512 << 10) <= block_bytes < (2 << 20) or (8 << 20) < block_bytes <= (16 << 20):
        s += 1.0
    # Larger level groups amortize the per-tile q computation.
    s += 0.1 * tile_l
    return s


def _choose_tiling(BC, n_levels, N_pad, in_isz, out_isz, cmp_isz, budget, gen):
    """Pick (tile_bc, tile_l, tile_n).  Invariants: tile_bc | BC, tile_l | n_levels,
    tile_n | N_pad, tile_n % 128 == 0, and (tile_l == 1 or tile_n == N_pad)."""
    total_bytes = BC * N_pad * in_isz + BC * n_levels * N_pad * out_isz

    def vmem_per_bc(tl, tn):
        # double-buffered in/out blocks + q scratch + headroom for temporaries
        return 2 * (tn * in_isz + tl * tn * out_isz) + tn * cmp_isz + 2 * tn * max(4, out_isz)

    def block_per_bc(tl, tn):
        return tn * in_isz + tl * tn * out_isz

    # Second-minor block dim must be a multiple of 8 or equal the full dim.
    bc_cands = [d for d in _divisors(BC) if d % 8 == 0 or d == BC]

    best = None
    # Preferred: full spatial extent per block, levels grouped (tile_l <= 8).
    for tl in [d for d in _divisors(n_levels) if d <= 8]:
        if vmem_per_bc(tl, N_pad) > budget:
            continue
        lsteps = n_levels // tl
        for d in bc_cands:
            if d * vmem_per_bc(tl, N_pad) > budget:
                continue
            sc = _score(d, tl, BC, d * block_per_bc(tl, N_pad), lsteps, gen, total_bytes)
            if best is None or sc > best[0]:
                best = (sc, (d, tl, N_pad))
    if best is not None:
        return best[1]

    # Fallback for huge images: split the lane axis too (tile_l forced to 1 so
    # each output block stays one contiguous, lane-aligned slab).
    tl = 1
    tn_cands = [t for t in _divisors(N_pad) if t % 128 == 0 and vmem_per_bc(tl, t) <= budget]
    tn = max(tn_cands) if tn_cands else 128
    other = n_levels * (N_pad // tn)
    best = (None, (min(bc_cands), tl, tn))
    for d in bc_cands:
        if d * vmem_per_bc(tl, tn) > budget:
            continue
        sc = _score(d, tl, BC, d * block_per_bc(tl, tn), other, gen, total_bytes)
        if best[0] is None or sc > best[0]:
            best = (sc, (d, tl, tn))
    return best[1]


# ---------------------------------------------------------------------------
# Kernel
# ---------------------------------------------------------------------------

def _make_kernel(n_levels, tile_l, tile_n, level_steps, cmp_dtype, wrap):
    cmp_is_float = jnp.issubdtype(jnp.dtype(cmp_dtype), jnp.floating)

    def kernel(x_ref, o_ref, q_ref):
        # x_ref: (tile_bc, tile_n)   o_ref: (tile_bc, tile_l*tile_n)   q_ref: scratch
        j = pl.program_id(2)  # level-group index (innermost grid axis)

        # q is computed once per resident (bc, spatial) tile; the level axis is
        # innermost/sequential, so j == 0 coincides with a fresh input tile and
        # the input block is never re-fetched across level steps.
        @pl.when(j == 0)
        def _():
            q = (x_ref[...] * float(n_levels)).astype(jnp.int32)
            if wrap:
                q = q & 0xFF  # PyTorch .byte(): trunc toward zero + wrap to 8 bits
            if cmp_is_float:
                q = q.astype(jnp.float32).astype(cmp_dtype)  # <=255 is exact in bf16
            q_ref[...] = q

        q = q_ref[...]
        if level_steps > 1:
            # Shift by this group's first level so the per-level compares below
            # are against static constants (all-vector ops).
            base = jnp.full((1, 1), j * tile_l, dtype=jnp.int32)
            if cmp_is_float:
                base = base.astype(jnp.float32)
            q = q - base.astype(cmp_dtype)

        for l in range(tile_l):  # tile_l <= 8: bounded unroll, lane-aligned stores
            o_ref[:, l * tile_n:(l + 1) * tile_n] = (q == l).astype(o_ref.dtype)

    return kernel


# ---------------------------------------------------------------------------
# Public wrapper
# ---------------------------------------------------------------------------

def hard_levels(x: jax.Array, n_levels: int, out_dtype=jnp.uint8, *,
                assume_byte_range: bool = False) -> jax.Array:
    """x: (B, C, H, W) float. Returns (B, C*n_levels, H, W) of out_dtype.

    assume_byte_range: if the caller guarantees 0 <= x*n_levels < 256, the 8-bit
    wrap is skipped (saves per-element VPU work, mainly relevant on v5e)."""
    if x.ndim != 4:
        raise ValueError("Input must be 4D tensor.")
    if n_levels > 255 or n_levels < 2:
        raise ValueError("n_levels must be a positive integer from 2 to 255.")

    out_np_dtype = np.dtype(out_dtype)
    B, C, H, W = x.shape
    BC, N = B * C, H * W
    N_pad = ((N + 127) // 128) * 128  # lane-align per-level slabs -> unmasked stores

    gen = _tpu_generation()
    # bf16 compares on v6e/v7x (bf16 VALU) halve 32-bit lane-op pressure of the
    # VALU-bound compare/select loop; v5e has no bf16 VALU -> keep int32.
    cmp_dtype = jnp.bfloat16 if (gen is not None and gen >= 6) else jnp.int32
    cmp_isz = np.dtype(cmp_dtype).itemsize

    capacity = _vmem_capacity_bytes(gen)
    budget = _vmem_budget_bytes(gen, capacity)
    tile_bc, tile_l, tile_n = _choose_tiling(
        BC, n_levels, N_pad, np.dtype(x.dtype).itemsize, out_np_dtype.itemsize,
        cmp_isz, budget, gen)

    x2 = x.reshape(BC, N)  # contiguous reshape: free
    if N_pad != N:
        # TODO(synk): non-128-multiple H*W trades one output slice-copy in XLA
        # for fully unmasked, lane-aligned in-kernel stores.
        x2 = jnp.pad(x2, ((0, 0), (0, N_pad - N)))

    grid = (BC // tile_bc, N_pad // tile_n, n_levels // tile_l)
    blocks_per_group = N_pad // tile_n  # == 1 whenever tile_l > 1 (tile_n == N_pad)

    kernel = _make_kernel(n_levels, tile_l, tile_n, grid[2], cmp_dtype,
                          wrap=not assume_byte_range)

    bytes_accessed = (BC * N_pad * np.dtype(x.dtype).itemsize
                      + BC * n_levels * N_pad * out_np_dtype.itemsize)

    out = pl.pallas_call(
        kernel,
        out_shape=jax.ShapeDtypeStruct((BC, n_levels * N_pad), out_np_dtype),
        grid_spec=pltpu.PrefetchScalarGridSpec(
            num_scalar_prefetch=0,
            grid=grid,
            in_specs=[pl.BlockSpec((tile_bc, tile_n), lambda i, s, j: (i, s))],
            out_specs=pl.BlockSpec((tile_bc, tile_l * tile_n),
                                   lambda i, s, j: (i, j * blocks_per_group + s)),
            scratch_shapes=[pltpu.VMEM((tile_bc, tile_n), cmp_dtype)],
        ),
        compiler_params=pltpu.CompilerParams(
            dimension_semantics=("parallel", "parallel", "arbitrary"),
            vmem_limit_bytes=_vmem_limit_bytes(capacity),
        ),
        cost_estimate=pl.CostEstimate(
            flops=int(BC * N_pad * (4 + 2 * n_levels)),
            transcendentals=0,
            bytes_accessed=int(bytes_accessed),
        ),
    )(x2)

    if N_pad != N:
        out = out.reshape(BC, n_levels, N_pad)[:, :, :N]
    # (BC, n_levels*N) is byte-identical to (B, C*n_levels, H, W): metadata-only reshape.
    return out.reshape(B, C * n_levels, H, W)


# ---------------------------------------------------------------------------
# Pure-JAX reference (mirrors PyTorch _hard_indicators)
# ---------------------------------------------------------------------------

def _reference(x, n_levels, out_dtype=jnp.uint8):
    B, C, H, W = x.shape
    q = ((x * n_levels).astype(jnp.int32) & 0xFF)[:, :, None, :, :]
    lv = jnp.arange(n_levels, dtype=jnp.int32)[None, None, :, None, None]
    return (q == lv).reshape(B, C * n_levels, H, W).astype(out_dtype)


if __name__ == "__main__":
    key = jax.random.PRNGKey(0)
    B, C, H, W = 2, 4, 16, 16
    n_levels = 4
    # The module's bin_centers buffer (deterministic; unused in forward).
    bin_centers = jnp.arange(n_levels, dtype=jnp.uint8)  # noqa: F841

    x = jax.random.uniform(key, (B, C, H, W), dtype=jnp.float32)
    # Boundary value: x == 1.0 -> q == n_levels -> no level fires (matches torch).
    x = x.at[0, 0, 0, 0].set(1.0)

    # 1) default uint8 output
    y = jax.block_until_ready(hard_levels(x, n_levels))
    y_ref = _reference(x, n_levels)
    assert y.shape == (B, C * n_levels, H, W) and y.dtype == jnp.uint8
    assert bool(jnp.all(y == y_ref))

    # 2) out_dtype produced in-kernel (no second HBM cast pass)
    yf = jax.block_until_ready(hard_levels(x, n_levels, out_dtype=jnp.float32))
    assert yf.dtype == jnp.float32
    assert bool(jnp.all(yf == y_ref.astype(jnp.float32)))

    # 3) exercise the level grid axis (n_levels > 8 -> multiple level steps)
    y16 = jax.block_until_ready(hard_levels(x, 16))
    assert bool(jnp.all(y16 == _reference(x, 16)))

    # 4) exercise lane padding (H*W not a multiple of 128) and odd n_levels
    x3 = jax.random.uniform(jax.random.PRNGKey(1), (2, 3, 12, 12), dtype=jnp.float32)
    y3 = jax.block_until_ready(hard_levels(x3, 5))
    assert y3.shape == (2, 15, 12, 12)
    assert bool(jnp.all(y3 == _reference(x3, 5)))

    print("KERNEL_OK")
</pallas_src>

<mosaic_0001>
module attributes {stable_mosaic.version = 11 : i64} {
  func.func @kernel(%arg0: i32, %arg1: i32, %arg2: i32, %arg3: memref<8x256xf32, #tpu.memory_space<vmem>>, %arg4: memref<8x1024xi8, #tpu.memory_space<vmem>>, %arg5: memref<8x256xi32, #tpu.memory_space<vmem>>) attributes {dimension_semantics = [#tpu.dimension_semantics<parallel>, #tpu.dimension_semantics<parallel>, #tpu.dimension_semantics<arbitrary>], iteration_bounds = array<i64: 1, 1, 1>, scalar_prefetch = 0 : i64, scratch_operands = 1 : i64, tpu.core_type = #tpu.core_type<tc>, window_params = [{transform_indices = @transform_0, window_bounds = array<i64: 8, 256>}, {transform_indices = @transform_1, window_bounds = array<i64: 8, 1024>}]} {
    %c0_i32 = arith.constant 0 : i32
    %0 = arith.cmpi eq, %arg2, %c0_i32 : i32
    %1 = arith.extui %0 : i1 to i32
    %c0_i32_0 = arith.constant 0 : i32
    %2 = arith.cmpi ne, %1, %c0_i32_0 : i32
    scf.if %2 {
      %c0_8 = arith.constant 0 : index
      %c0_9 = arith.constant 0 : index
      %20 = vector.load %arg3[%c0_8, %c0_9] : memref<8x256xf32, #tpu.memory_space<vmem>>, vector<8x256xf32>
      %cst = arith.constant 4.000000e+00 : f32
      %21 = vector.broadcast %cst : f32 to vector<8x256xf32>
      %22 = arith.mulf %20, %21 : vector<8x256xf32>
      %23 = arith.fptosi %22 : vector<8x256xf32> to vector<8x256xi32>
      %c255_i32 = arith.constant 255 : i32
      %24 = vector.broadcast %c255_i32 : i32 to vector<8x256xi32>
      %25 = arith.andi %23, %24 : vector<8x256xi32>
      %c0_10 = arith.constant 0 : index
      %c0_11 = arith.constant 0 : index
      %26 = vector.load %arg5[%c0_10, %c0_11] : memref<8x256xi32, #tpu.memory_space<vmem>>, vector<8x256xi32>
      tpu.vector_store %arg5[%c0_10, %c0_11], %25 {strides = array<i32>} : memref<8x256xi32, #tpu.memory_space<vmem>>, vector<8x256xi32>,
    } else {
    }
    %c0 = arith.constant 0 : index
    %c0_1 = arith.constant 0 : index
    %3 = vector.load %arg5[%c0, %c0_1] : memref<8x256xi32, #tpu.memory_space<vmem>>, vector<8x256xi32>
    %c0_i32_2 = arith.constant 0 : i32
    %4 = vector.broadcast %c0_i32_2 : i32 to vector<8x256xi32>
    %5 = arith.cmpi eq, %3, %4 : vector<8x256xi32>
    %6 = arith.extui %5 : vector<8x256xi1> to vector<8x256xi8>
    %c0_3 = arith.constant 0 : index
    %c0_4 = arith.constant 0 : index
    %7 = vector.load %arg4[%c0_3, %c0_4] : memref<8x1024xi8, #tpu.memory_space<vmem>>, vector<8x256xi8>
    tpu.vector_store %arg4[%c0_3, %c0_4], %6 {strides = array<i32>} : memref<8x1024xi8, #tpu.memory_space<vmem>>, vector<8x256xi8>,
    %c1_i32 = arith.constant 1 : i32
    %8 = vector.broadcast %c1_i32 : i32 to vector<8x256xi32>
    %9 = arith.cmpi eq, %3, %8 : vector<8x256xi32>
    %10 = arith.extui %9 : vector<8x256xi1> to vector<8x256xi8>
    %c0_5 = arith.constant 0 : index
    %c256 = arith.constant 256 : index
    %11 = vector.load %arg4[%c0_5, %c256] : memref<8x1024xi8, #tpu.memory_space<vmem>>, vector<8x256xi8>
    tpu.vector_store %arg4[%c0_5, %c256], %10 {strides = array<i32>} : memref<8x1024xi8, #tpu.memory_space<vmem>>, vector<8x256xi8>,
    %c2_i32 = arith.constant 2 : i32
    %12 = vector.broadcast %c2_i32 : i32 to vector<8x256xi32>
    %13 = arith.cmpi eq, %3, %12 : vector<8x256xi32>
    %14 = arith.extui %13 : vector<8x256xi1> to vector<8x256xi8>
    %c0_6 = arith.constant 0 : index
    %c512 = arith.constant 512 : index
    %15 = vector.load %arg4[%c0_6, %c512] : memref<8x1024xi8, #tpu.memory_space<vmem>>, vector<8x256xi8>
    tpu.vector_store %arg4[%c0_6, %c512], %14 {strides = array<i32>} : memref<8x1024xi8, #tpu.memory_space<vmem>>, vector<8x256xi8>,
    %c3_i32 = arith.constant 3 : i32
    %16 = vector.broadcast %c3_i32 : i32 to vector<8x256xi32>
    %17 = arith.cmpi eq, %3, %16 : vector<8x256xi32>
    %18 = arith.extui %17 : vector<8x256xi1> to vector<8x256xi8>
    %c0_7 = arith.constant 0 : index
    %c768 = arith.constant 768 : index
    %19 = vector.load %arg4[%c0_7, %c768] : memref<8x1024xi8, #tpu.memory_space<vmem>>, vector<8x256xi8>
    tpu.vector_store %arg4[%c0_7, %c768], %18 {strides = array<i32>} : memref<8x1024xi8, #tpu.memory_space<vmem>>, vector<8x256xi8>,
    return
  }
  func.func @transform_0(%arg0: i32, %arg1: i32, %arg2: i32) -> (i32, i32) {
    %c0_i32 = arith.constant 0 : i32
    return %arg0, %arg1 : i32, i32
  }
  func.func @transform_1(%arg0: i32, %arg1: i32, %arg2: i32) -> (i32, i32) {
    %c1_i32 = arith.constant 1 : i32
    %0 = arith.muli %arg2, %c1_i32 : i32
    %1 = arith.addi %0, %arg1 : i32
    %c0_i32 = arith.constant 0 : i32
    return %arg0, %1 : i32, i32
  }
}

</mosaic_0001>

<bundles_post_ra>
// kernel: tpu_custom_call.1
= control target key start
LH: loop header
LB: loop body
LE: loop exit
PB: predicated region body
PF: predicated region fallthrough
CT: control target
= control target key end

     0   :  { %6 = vsyncpa [#allocation4], 0  ;;  %s224_s0 = inlined_call_operand.hbm [shape: f32[8,256], index: 0, kind: input, shape index: {}]   ;;  %s225_s1 = inlined_call_operand.hbm [shape: u8[8,1024], index: 1, kind: output, shape index: {}]  }
   0x1   :  { %7 = vsyncpa [#allocation5], 0  ;;  %s13_s8 = sshll.u32 %s224_s0, 4  ;;  %s205_s9 = smov [#allocation3]   ;;  %s14_s8 = int_to_ptr.hbm [resolvable:$true] %s13_s8 }
   0x2   :  { %s15_s10 = sshll.u32 %s205_s9, 4  ;;  %s16_s10 = int_to_ptr.vmem [resolvable:$true] %s15_s10 }
   0x3   :  { %18 = dma.hbm_to_vmem [thread:$0]  %s14_s8, 256, %s16_s10, [#allocation4]  }
   0x4   :  { %201 = dma.done.wait [#allocation4], 256  }
   0x5   :  { %202 = vsyncadd [#allocation4], 4294967040  ;;  %v31_v0 = vld [vmem:[#allocation3] sm:$0xff]  ;;  %v32_v1 = vld [vmem:[#allocation3 + $0x8] sm:$0xff]  ;;  %v206_v14 = vmov 0   ;;  %s207_s0 = smov [#allocation6]  }
   0x6   :  { %v33_v2 = vmul.f32 4.0, %v31_v0  ;;  %v34_v3 = vmul.f32 4.0, %v32_v1  ;;  %s128_s11 = sshll.u32 %s207_s0, 4  ;;  %s130_s14 = sshll.u32 %s225_s1, 4  ;;  %s129_s11 = int_to_ptr.vmem [resolvable:$true] %s128_s11  ;;  %s131_s14 = int_to_ptr.hbm [resolvable:$true] %s130_s14 }
   0x8   :  { %vm140_vm0 = vcmp.lt.s32.totalorder %v33_v2, 0  ;;  %v141_v4 = vceil.f32 %v33_v2  ;;  %v142_v5 = vfloor.f32 %v33_v2  ;;  %vm145_vm1 = vcmp.lt.s32.totalorder %v34_v3, 0 }
   0x9   :  { %v146_v6 = vceil.f32 %v34_v3  ;;  %v147_v7 = vfloor.f32 %v34_v3 }
   0xa   :  { %v143_v8 = vsel %vm140_vm0, %v141_v4, %v142_v5 }
   0xb   :  { %v144_v9 = vcvt.f32.s32 %v143_v8  ;;  %v148_v10 = vsel %vm145_vm1, %v146_v6, %v147_v7 }
   0xc   :  { %v149_v11 = vcvt.f32.s32 %v148_v10 }
   0xd   :  { %v37_v12 = vand.u32 255, %v144_v9 }
   0xe   :  { %v38_v13 = vand.u32 255, %v149_v11 }
   0xf   :  { %vm43_vm2 = vcmp.eq.s32.totalorder %v37_v12, 0  ;;  %vm62_vm3 = vcmp.eq.s32.totalorder %v37_v12, 1  ;;  %vm81_vm8 = vcmp.eq.s32.totalorder %v37_v12, 2  ;;  %vm100_vm12 = vcmp.eq.s32.totalorder %v37_v12, 3 }
  0x10   :  { %vm44_vm4 = vcmp.eq.s32.totalorder %v38_v13, 0  ;;  %vm45_vm5 = vmpackc.low %vm43_vm2, %vm43_vm2  ;;  %vm63_vm6 = vcmp.eq.s32.totalorder %v38_v13, 1  ;;  %vm82_vm10 = vcmp.eq.s32.totalorder %v38_v13, 2  ;;  %vm101_vm15 = vcmp.eq.s32.totalorder %v38_v13, 3 }
  0x11   :  { %v46_v15 = vsel %vm45_vm5, 16711935, %v206_v14  ;;  %vm50_vm7 = vmpackc.low %vm44_vm4, %vm44_vm4 }
  0x12   :  { %v48_v16 = vpack.c.b8 %v46_v15, %v46_v15  ;;  %v51_v17 = vsel %vm50_vm7, 16711935, %v206_v14  ;;  %vm64_vm9 = vmpackc.low %vm62_vm3, %vm62_vm3 }
  0x13   :  { %v53_v18 = vpack.c.b8 %v51_v17, %v51_v17  ;;  %v65_v19 = vsel %vm64_vm9, 16711935, %v206_v14  ;;  %vm69_vm11 = vmpackc.low %vm63_vm6, %vm63_vm6 }
  0x14   :  { %vm49_vm13 = vnez %v48_v16  ;;  %v67_v20 = vpack.c.b8 %v65_v19, %v65_v19  ;;  %v70_v21 = vsel %vm69_vm11, 16711935, %v206_v14  ;;  %vm83_vm14 = vmpackc.low %vm81_vm8, %vm81_vm8 }
  0x15   :  { %vm54_vm0 = vnez %v53_v18  ;;  %v55_v22 = vsel %vm49_vm13, 16843009, %v206_v14  ;;  %v72_v23 = vpack.c.b8 %v70_v21, %v70_v21  ;;  %v84_v24 = vsel %vm83_vm14, 16711935, %v206_v14  ;;  %vm88_vm1 = vmpackc.low %vm82_vm10, %vm82_vm10 }
  0x16   :  { %v56_v25 = vsel %vm54_vm0, 16843009, %v206_v14  ;;  %v57_v26 = vunpack.c.0.s8 %v55_v22  ;;  %vm68_vm2 = vnez %v67_v20  ;;  %v86_v27 = vpack.c.b8 %v84_v24, %v84_v24  ;;  %vm102_vm3 = vmpackc.low %vm100_vm12, %vm100_vm12 }
  0x17   :  { %v58_v28 = vunpack.c.0.s8 %v56_v25  ;;  %vm73_vm4 = vnez %v72_v23  ;;  %v74_v29 = vsel %vm68_vm2, 16843009, %v206_v14  ;;  %v89_v30 = vsel %vm88_vm1, 16711935, %v206_v14  ;;  %vm107_vm5 = vmpackc.low %vm101_vm15, %vm101_vm15 }
  0x18   :  { %v75_v31 = vsel %vm73_vm4, 16843009, %v206_v14  ;;  %v76_v32 = vunpack.c.0.s8 %v74_v29  ;;  %vm87_vm6 = vnez %v86_v27  ;;  %v91_v33 = vpack.c.b8 %v89_v30, %v89_v30 }
  0x19   :  { %v59_v34 = vpack.c.b16 %v58_v28, %v57_v26  ;;  %v77_v35 = vunpack.c.0.s8 %v75_v31  ;;  %v93_v36 = vsel %vm87_vm6, 16843009, %v206_v14  ;;  %v103_v37 = vsel %vm102_vm3, 16711935, %v206_v14 }
  0x1a   :  { %vm92_vm7 = vnez %v91_v33  ;;  %v95_v38 = vunpack.c.0.s8 %v93_v36  ;;  %v105_v39 = vpack.c.b8 %v103_v37, %v103_v37  ;;  %v108_v40 = vsel %vm107_vm5, 16711935, %v206_v14 }
  0x1b   :  { %v60_v41 = vpack.c.b8 %v59_v34, %v59_v34  ;;  %v78_v42 = vpack.c.b16 %v77_v35, %v76_v32  ;;  %v94_v43 = vsel %vm92_vm7, 16843009, %v206_v14  ;;  %v110_v44 = vpack.c.b8 %v108_v40, %v108_v40 }
  0x1c   :  { %v96_v45 = vunpack.c.0.s8 %v94_v43  ;;  %vm106_vm8 = vnez %v105_v39 }
  0x1d   :  { %61 = vst [vmem:[#allocation6] sm:$0xf] %v60_v41  ;;  %v79_v46 = vpack.c.b8 %v78_v42, %v78_v42  ;;  %vm111_vm9 = vnez %v110_v44  ;;  %v112_v47 = vsel %vm106_vm8, 16843009, %v206_v14 }
  0x1e   :  { %v97_v48 = vpack.c.b16 %v96_v45, %v95_v38  ;;  %v113_v49 = vsel %vm111_vm9, 16843009, %v206_v14  ;;  %v114_v50 = vunpack.c.0.s8 %v112_v47 }
  0x1f   :  { %80 = vst [vmem:[#allocation6 + $0x4] sm:$0xf] %v79_v46  ;;  %v115_v51 = vunpack.c.0.s8 %v113_v49 }
  0x20   :  { %v98_v52 = vpack.c.b8 %v97_v48, %v97_v48 }
  0x21   :  { %v116_v53 = vpack.c.b16 %v115_v51, %v114_v50 }
  0x22   :  { %99 = vst [vmem:[#allocation6 + $0x8] sm:$0xf] %v98_v52 }
  0x23   :  { %v117_v54 = vpack.c.b8 %v116_v53, %v116_v53 }
  0x25   :  { %118 = vst [vmem:[#allocation6 + $0xc] sm:$0xf] %v117_v54 }
  0x26   :  { %133 = dma.vmem_to_hbm [thread:$0]  %s129_s11, 256, %s131_s14, [#allocation5]  }
  0x27   :  { %203 = dma.done.wait [#allocation5], 256  }
  0x28   :  { %204 = vsyncadd [#allocation5], 4294967040 }
  0x29   :  { %138 = vsyncpa [#allocation4], 1 }
  0x2a   :  { %139 = vsyncpa [#allocation5], 1 }

</bundles_post_ra>
